<compile_context>
chip_gen: v5e
topology: v5e:2x2
jax: 0.10.0
libtpu: 0.0.40
codegen_flags: <defaults>
</compile_context>

<pallas_src>
import jax
import jax.numpy as jnp
from jax.experimental import pallas as pl
from jax.experimental.pallas import tpu as pltpu

_LANE = 128
_LANE_CAP = 32 * _LANE            # max lane width considered (4096 elements)
_MAX_BLOCK_BYTES = 6 << 20        # ~6 MiB per block (safe on v5e/v6e/v7x)
_VMEM_LIMIT_BYTES = 48 << 20      # above v5e's 16 MiB scoped default, < v7x 64 MiB


def _identity_copy_kernel(x_ref, o_ref):
    # Forward body of the base class is `pass`; the closest runnable kernel
    # semantics is a pass-through of the input block (pure ref-to-ref copy).
    o_ref[...] = x_ref[...]


def _choose_lane(total: int):
    """Largest multiple of 128 (<= cap) dividing `total`, preferring rows >= 16.

    rows >= 16 guarantees >= 2 grid steps so the "parallel" grid axis can be
    sharded across both v7x TensorCores.  Returns None if no 128-multiple
    divides `total` (caller falls back to the no-op path).
    """
    best_rows16 = None
    best_any = None
    lane = _LANE
    cap = min(total, _LANE_CAP)
    while lane <= cap:
        if total % lane == 0:
            best_any = lane
            if total // lane >= 16:
                best_rows16 = lane
        lane += _LANE
    return best_rows16 if best_rows16 is not None else best_any


def _choose_tile_rows(rows: int, lane: int, itemsize: int) -> int:
    """Row tile: multiple of 8, block <= ~6 MiB, and >= 2 grid steps when possible."""
    if rows < 16:
        # Full-extent block (exempt from the (8,128) divisibility rule).
        return rows
    budget_rows = max(8, _MAX_BLOCK_BYTES // max(1, lane * itemsize))
    tile = min(rows // 2, budget_rows)      # at least 2 grid steps
    tile = max(8, (tile // 8) * 8)          # multiple of 8 sublanes
    return tile


def _pallas_identity_2d(x2d: jax.Array) -> jax.Array:
    rows, lane = x2d.shape
    itemsize = jnp.dtype(x2d.dtype).itemsize
    tile_r = _choose_tile_rows(rows, lane, itemsize)
    grid = (pl.cdiv(rows, tile_r),)

    return pl.pallas_call(
        _identity_copy_kernel,
        out_shape=jax.ShapeDtypeStruct((rows, lane), x2d.dtype),
        grid=grid,
        in_specs=[pl.BlockSpec((tile_r, lane), lambda i: (i, 0))],
        out_specs=pl.BlockSpec((tile_r, lane), lambda i: (i, 0)),
        cost_estimate=pl.CostEstimate(
            flops=0,
            transcendentals=0,
            bytes_accessed=2 * rows * lane * itemsize,
        ),
        compiler_params=pltpu.CompilerParams(
            dimension_semantics=("parallel",),
            vmem_limit_bytes=_VMEM_LIMIT_BYTES,
        ),
    )(x2d)


def _pallas_identity(x: jax.Array) -> jax.Array:
    """Pallas pass-through of an arbitrary tensor (lane-dense tiled copy)."""
    total = x.size
    lane = _choose_lane(total)
    if lane is None:
        # TODO(synk): element count not a multiple of 128; for the no-op base
        # class the faithful (and optimal) behaviour is simply returning x.
        return x
    rows = total // lane
    y2d = _pallas_identity_2d(x.reshape(rows, lane))
    return y2d.reshape(x.shape)


# Kernel-backed identity (plumbing path, used once a real forward exists).
pallas_forward = jax.jit(_pallas_identity)


def my_model_forward(x: jax.Array) -> jax.Array:
    """MyModel.forward: the base-class body is `pass` -> optimal is a pure no-op.

    TODO(synk): replace with real compute (via pallas_forward-style kernels)
    once a concrete subclass defines forward / loss / optimizer.
    """
    return x


if __name__ == "__main__":
    key = jax.random.PRNGKey(0)
    # Small NCHW input consistent with a generic vision-style base model.
    x = jax.random.normal(key, (2, 4, 16, 16), dtype=jnp.float32)

    # 1) The faithful forward: no-op.
    y_noop = my_model_forward(x)
    assert y_noop.shape == x.shape and y_noop.dtype == x.dtype

    # 2) Exercise the Pallas plumbing path once and block on the result.
    y = pallas_forward(x)
    y = jax.block_until_ready(y)

    assert y.shape == x.shape and y.dtype == x.dtype
    assert bool(jnp.allclose(y, x))

    print("KERNEL_OK")
</pallas_src>

<mosaic_0001>
module attributes {stable_mosaic.version = 11 : i64} {
  func.func @_identity_copy_kernel(%arg0: i32, %arg1: memref<8x128xf32, #tpu.memory_space<vmem>>, %arg2: memref<8x128xf32, #tpu.memory_space<vmem>>) attributes {dimension_semantics = [#tpu.dimension_semantics<parallel>], iteration_bounds = array<i64: 2>, scalar_prefetch = 0 : i64, scratch_operands = 0 : i64, tpu.core_type = #tpu.core_type<tc>, window_params = [{transform_indices = @transform_0, window_bounds = array<i64: 8, 128>}, {transform_indices = @transform_1, window_bounds = array<i64: 8, 128>}]} {
    %c0 = arith.constant 0 : index
    %c0_0 = arith.constant 0 : index
    %0 = vector.load %arg1[%c0, %c0_0] : memref<8x128xf32, #tpu.memory_space<vmem>>, vector<8x128xf32>
    %c0_1 = arith.constant 0 : index
    %c0_2 = arith.constant 0 : index
    %1 = vector.load %arg2[%c0_1, %c0_2] : memref<8x128xf32, #tpu.memory_space<vmem>>, vector<8x128xf32>
    tpu.vector_store %arg2[%c0_1, %c0_2], %0 {strides = array<i32>} : memref<8x128xf32, #tpu.memory_space<vmem>>, vector<8x128xf32>,
    return
  }
  func.func @transform_0(%arg0: i32) -> (i32, i32) {
    %c0_i32 = arith.constant 0 : i32
    %c0_i32_0 = arith.constant 0 : i32
    return %arg0, %c0_i32 : i32, i32
  }
  func.func @transform_1(%arg0: i32) -> (i32, i32) {
    %c0_i32 = arith.constant 0 : i32
    %c0_i32_0 = arith.constant 0 : i32
    return %arg0, %c0_i32 : i32, i32
  }
}

</mosaic_0001>

<bundles_post_ra>
// kernel: _pallas_identity.1
= control target key start
LH: loop header
LB: loop body
LE: loop exit
PB: predicated region body
PF: predicated region fallthrough
CT: control target
= control target key end

     0   :  { %s188_s6 = smov 0   ;;  %s208_s0 = inlined_call_operand.vmem [shape: f32[16,128], index: 0, kind: input, shape index: {}]   ;;  %s209_s1 = inlined_call_operand.vmem [shape: f32[16,128], index: 1, kind: output, shape index: {}]  }
   0x1 LB: > { %s167_s7 = sadd.s32 4294967295, %s190_s6   ;;  %p171_p0 = scmp.ge.s32.totalorder %s190_s6, 1  ;;  %s190_s6 = sphi %s188_s6, %s11_s6  }
   0x2   : > { %p86_p1 = scmp.lt.s32.totalorder %s190_s6, 3 }
   0x4   : > { %p87_p2 = pnand %p171_p0, %p86_p1 }
   0x5   : > { %p104_p3 = scmp.lt.s32.totalorder (!%p87_p2), %s167_s7, 1 }
   0x6   : > { %90 = sbr.rel (%p87_p2) target bundleno = 16 (0x10), region = 24 }
   0xb   : > { %s211_s7 = smov (!%p104_p3, %s167_s7), 1 }
   0xc   : > { %s172_s8 = sshll.u32 %s211_s7, 3 }
   0xd   : > { %s107_s11 = scalar_lea.vmem %s208_s0, %s172_s8  ;;  %s111_s14 = scalar_lea.vmem %s209_s1, %s172_s8 }
   0xe   : > { %v112_v0 = vld [vmem:[%s107_s11] sm:$0xff] }
   0xf   : > { %113 = vst [vmem:[%s111_s14] sm:$0xff] %v112_v0 }
  0x10 PF: > { %s11_s6 = sadd.s32 1, %s190_s6  }
  0x11   : > { %p8_p4 = scmp.ge.s32.totalorder %s11_s6, 4  }
  0x13   :  { %10 = sbr.rel (!%p8_p4) target bundleno = 1 (0x1), region = 54 }

</bundles_post_ra>
